<compile_context>
chip_gen: v7x
topology: tpu7x:2x2x1
jax: 0.10.0
libtpu: 0.0.40
codegen_flags: <defaults>
</compile_context>

<pallas_src>
import functools

import jax
import jax.numpy as jnp
from jax.experimental import pallas as pl
from jax.experimental.pallas import tpu as pltpu

BN_EPS = 1e-5


def _round_up(x, m):
    return ((x + m - 1) // m) * m


def _mlp_kernel(out_dims, offsets, user_ref, movie_ref,
                w1u_ref, w1m_ref, w2_ref, w3_ref, w4_ref, w5_ref, wo_ref,
                b_ref, out_ref):
    """Fused MLP: (Linear[+folded BN] -> ReLU) x5 -> Linear (output projection).

    out_dims / offsets are static Python tuples describing the packed-bias layout.
    All segment widths / offsets are multiples of 128, so every slice is lane-aligned.
    Matmuls run on the MXU in bf16 with f32 accumulation; elementwise stays f32.
    """

    def bias(i):
        # Static, 128-aligned, full-width (multiple of 128) lane slice.
        return b_ref[:, offsets[i]:offsets[i] + out_dims[i]]

    # Layer 1: fused "concat" -> split matmul over the user / movie halves of W1.
    h = (jnp.dot(user_ref[...], w1u_ref[...], preferred_element_type=jnp.float32)
         + jnp.dot(movie_ref[...], w1m_ref[...], preferred_element_type=jnp.float32)
         + bias(0))
    x = jnp.maximum(h, 0.0)

    # Layers 2..5 (BN folded into w/b, Dropout = identity in eval mode).
    for i, w_ref in enumerate((w2_ref, w3_ref, w4_ref, w5_ref)):
        h = (jnp.dot(x.astype(w_ref.dtype), w_ref[...],
                     preferred_element_type=jnp.float32) + bias(i + 1))
        x = jnp.maximum(h, 0.0)

    # Output projection (lane-padded to a multiple of 128); no BN / activation.
    out_ref[...] = (jnp.dot(x.astype(wo_ref.dtype), wo_ref[...],
                            preferred_element_type=jnp.float32) + bias(5))


def _fold_bn(w, b, gamma, beta, mean, var, eps=BN_EPS):
    """Fold eval-mode BatchNorm1d into the preceding Linear (x @ w + b)."""
    scale = gamma * jax.lax.rsqrt(var + eps)            # (1, out)
    return w * scale, (b - mean) * scale + beta


def recommendation_forward(user_ids, movie_feats, params, *,
                           compute_dtype=jnp.bfloat16, tile_b=256):
    """Embedding gather (JAX) + one Pallas kernel for the whole MLP."""
    emb_table = params["embedding"]
    user_emb = jnp.take(emb_table, user_ids, axis=0)          # (B, user_dim)

    user_dim = user_emb.shape[1]
    batch = user_emb.shape[0]

    # ---- Fold BN into each hidden Linear -----------------------------------
    folded = [
        _fold_bn(l["w"], l["b"], l["gamma"], l["beta"], l["mean"], l["var"])
        for l in params["layers"]
    ]

    # ---- Pad every layer to 128-lane-dense widths (zeros are exact no-ops) --
    hidden_w, hidden_b = [], []
    prev_out_pad = None
    for idx, (w, b) in enumerate(folded):
        in_dim, out_dim = w.shape
        out_pad = _round_up(out_dim, 128)
        in_pad = in_dim if idx == 0 else prev_out_pad      # match previous padding
        w = jnp.pad(w, ((0, in_pad - in_dim), (0, out_pad - out_dim)))
        b = jnp.pad(b, ((0, 0), (0, out_pad - out_dim)))
        hidden_w.append(w)
        hidden_b.append(b)
        prev_out_pad = out_pad

    w_out, b_out = params["out_w"], params["out_b"]
    n_classes = w_out.shape[1]
    n_out_pad = _round_up(max(n_classes, 128), 128)
    wo = jnp.pad(w_out, ((0, prev_out_pad - w_out.shape[0]), (0, n_out_pad - n_classes)))
    bo = jnp.pad(b_out, ((0, 0), (0, n_out_pad - n_classes)))

    # Split the first layer into user / movie halves (fused concat).
    w1 = hidden_w[0]
    w1u, w1m = w1[:user_dim, :], w1[user_dim:, :]

    # ---- Pack all biases into one (1, total) array (128-aligned segments) ---
    out_dims = [w.shape[1] for w in hidden_w] + [n_out_pad]
    biases = hidden_b + [bo]
    offsets, off = [], 0
    for d in out_dims:
        offsets.append(off)
        off += d
    b_packed = jnp.concatenate(biases, axis=1).astype(jnp.float32)  # (1, total)

    # ---- Matmul operands in compute_dtype (bf16), f32 accumulation ---------
    weights = [w.astype(compute_dtype)
               for w in (w1u, w1m, hidden_w[1], hidden_w[2],
                         hidden_w[3], hidden_w[4], wo)]

    # ---- Batch tiling (parallel grid) ---------------------------------------
    tile_b_eff = min(tile_b, _round_up(batch, 8))
    b_pad = _round_up(batch, tile_b_eff)
    user_p = jnp.pad(user_emb, ((0, b_pad - batch), (0, 0))).astype(compute_dtype)
    movie_p = jnp.pad(movie_feats, ((0, b_pad - batch), (0, 0))).astype(compute_dtype)
    movie_dim = movie_p.shape[1]

    kernel = functools.partial(_mlp_kernel, tuple(out_dims), tuple(offsets))

    act_specs = [
        pl.BlockSpec((tile_b_eff, user_dim), lambda i: (i, 0)),
        pl.BlockSpec((tile_b_eff, movie_dim), lambda i: (i, 0)),
    ]
    weight_specs = [pl.BlockSpec(w.shape, lambda i: (0, 0)) for w in weights]
    bias_spec = [pl.BlockSpec(b_packed.shape, lambda i: (0, 0))]

    out = pl.pallas_call(
        kernel,
        out_shape=jax.ShapeDtypeStruct((b_pad, n_out_pad), jnp.float32),
        grid_spec=pltpu.PrefetchScalarGridSpec(
            num_scalar_prefetch=0,
            grid=(b_pad // tile_b_eff,),
            in_specs=act_specs + weight_specs + bias_spec,
            out_specs=pl.BlockSpec((tile_b_eff, n_out_pad), lambda i: (i, 0)),
        ),
        compiler_params=pltpu.CompilerParams(
            dimension_semantics=("parallel",)),
    )(user_p, movie_p, *weights, b_packed)

    return out[:batch, :n_classes]


# ---------------------------- reference (pure JAX, f32) -----------------------
def recommendation_reference(user_ids, movie_feats, params):
    x = jnp.concatenate(
        [jnp.take(params["embedding"], user_ids, axis=0), movie_feats], axis=1)
    for l in params["layers"]:
        h = x @ l["w"] + l["b"]
        h = (h - l["mean"]) * jax.lax.rsqrt(l["var"] + BN_EPS) * l["gamma"] + l["beta"]
        x = jnp.maximum(h, 0.0)
    return x @ params["out_w"] + params["out_b"]


def init_params(key, n_users, user_dim, movie_dim, n_classes):
    dims = [user_dim + movie_dim, 256, 128, 64, 32, 16]
    keys = jax.random.split(key, 2 + 4 * (len(dims) - 1) + 2)
    ki = iter(range(len(keys)))

    embedding = jax.random.normal(keys[next(ki)], (n_users, user_dim), jnp.float32) * 0.1

    layers = []
    for i in range(len(dims) - 1):
        fan_in, fan_out = dims[i], dims[i + 1]
        w = jax.random.normal(keys[next(ki)], (fan_in, fan_out), jnp.float32) * (
            1.0 / jnp.sqrt(fan_in))
        b = jax.random.normal(keys[next(ki)], (1, fan_out), jnp.float32) * 0.01
        gamma = 1.0 + 0.1 * jax.random.normal(keys[next(ki)], (1, fan_out), jnp.float32)
        beta = 0.05 * jax.random.normal(keys[next(ki)], (1, fan_out), jnp.float32)
        mean = jnp.zeros((1, fan_out), jnp.float32) + 0.01 * i
        var = jnp.ones((1, fan_out), jnp.float32)
        layers.append(
            {"w": w, "b": b, "gamma": gamma, "beta": beta, "mean": mean, "var": var})

    w_out = jax.random.normal(keys[next(ki)], (dims[-1], n_classes), jnp.float32) * (
        1.0 / jnp.sqrt(dims[-1]))
    b_out = jax.random.normal(keys[next(ki)], (1, n_classes), jnp.float32) * 0.01

    return {"embedding": embedding, "layers": layers, "out_w": w_out, "out_b": b_out}


if __name__ == "__main__":
    n_users = 100
    user_embedding_dim = 32
    movie_text_embedding_dim = 96
    n_classes = 10
    batch = 8

    key = jax.random.PRNGKey(0)
    k_params, k_user, k_movie = jax.random.split(key, 3)

    params = init_params(
        k_params, n_users, user_embedding_dim, movie_text_embedding_dim, n_classes)
    user_ids = jax.random.randint(k_user, (batch,), 0, n_users, dtype=jnp.int32)
    movie_feats = jax.random.normal(
        k_movie, (batch, movie_text_embedding_dim), jnp.float32)

    out = recommendation_forward(user_ids, movie_feats, params)
    out = jax.block_until_ready(out)

    assert out.shape == (batch, n_classes), out.shape
    assert bool(jnp.all(jnp.isfinite(out)))

    # Loose check against the f32 reference (kernel matmuls run in bf16).
    ref = recommendation_reference(user_ids, movie_feats, params)
    err = jnp.max(jnp.abs(out - ref))
    tol = 0.05 * (jnp.max(jnp.abs(ref)) + 1.0)
    assert err <= tol, (err, tol)

    print("KERNEL_OK")
</pallas_src>

<mosaic_0001>
module attributes {stable_mosaic.version = 11 : i64} {
  func.func @_mlp_kernel(%arg0: i32, %arg1: memref<8x32xbf16, #tpu.memory_space<vmem>>, %arg2: memref<8x96xbf16, #tpu.memory_space<vmem>>, %arg3: memref<32x256xbf16, #tpu.memory_space<vmem>>, %arg4: memref<96x256xbf16, #tpu.memory_space<vmem>>, %arg5: memref<256x128xbf16, #tpu.memory_space<vmem>>, %arg6: memref<128x128xbf16, #tpu.memory_space<vmem>>, %arg7: memref<128x128xbf16, #tpu.memory_space<vmem>>, %arg8: memref<128x128xbf16, #tpu.memory_space<vmem>>, %arg9: memref<128x128xbf16, #tpu.memory_space<vmem>>, %arg10: memref<1x896xf32, #tpu.memory_space<vmem>>, %arg11: memref<8x128xf32, #tpu.memory_space<vmem>>) attributes {dimension_semantics = [#tpu.dimension_semantics<parallel>], iteration_bounds = array<i64: 1>, scalar_prefetch = 0 : i64, scratch_operands = 0 : i64, tpu.core_type = #tpu.core_type<tc>, window_params = [{transform_indices = @transform_0, window_bounds = array<i64: 8, 32>}, {transform_indices = @transform_1, window_bounds = array<i64: 8, 96>}, {pipeline_mode = #tpu.pipeline_mode<synchronous>, transform_indices = @transform_2, window_bounds = array<i64: 32, 256>}, {pipeline_mode = #tpu.pipeline_mode<synchronous>, transform_indices = @transform_3, window_bounds = array<i64: 96, 256>}, {pipeline_mode = #tpu.pipeline_mode<synchronous>, transform_indices = @transform_4, window_bounds = array<i64: 256, 128>}, {pipeline_mode = #tpu.pipeline_mode<synchronous>, transform_indices = @transform_5, window_bounds = array<i64: 128, 128>}, {pipeline_mode = #tpu.pipeline_mode<synchronous>, transform_indices = @transform_6, window_bounds = array<i64: 128, 128>}, {pipeline_mode = #tpu.pipeline_mode<synchronous>, transform_indices = @transform_7, window_bounds = array<i64: 128, 128>}, {pipeline_mode = #tpu.pipeline_mode<synchronous>, transform_indices = @transform_8, window_bounds = array<i64: 128, 128>}, {pipeline_mode = #tpu.pipeline_mode<synchronous>, transform_indices = @transform_9, window_bounds = array<i64: 1, 896>}, {transform_indices = @transform_10, window_bounds = array<i64: 8, 128>}]} {
    %c0 = arith.constant 0 : index
    %c0_0 = arith.constant 0 : index
    %0 = vector.load %arg1[%c0, %c0_0] : memref<8x32xbf16, #tpu.memory_space<vmem>>, vector<8x32xbf16>
    %c0_1 = arith.constant 0 : index
    %c0_2 = arith.constant 0 : index
    %1 = vector.load %arg3[%c0_1, %c0_2] : memref<32x256xbf16, #tpu.memory_space<vmem>>, vector<32x256xbf16>
    %cst = arith.constant dense<0.000000e+00> : vector<8x256xf32>
    %2 = tpu.matmul %0, %1, %cst {dimension_numbers = #tpu.dot_dimension_numbers<[1], [0], [0], [1], [0, 0, 1, 1], [], []>} : vector<8x32xbf16>, vector<32x256xbf16>, vector<8x256xf32> -> vector<8x256xf32>
    %c0_3 = arith.constant 0 : index
    %c0_4 = arith.constant 0 : index
    %3 = vector.load %arg2[%c0_3, %c0_4] : memref<8x96xbf16, #tpu.memory_space<vmem>>, vector<8x96xbf16>
    %c0_5 = arith.constant 0 : index
    %c0_6 = arith.constant 0 : index
    %4 = vector.load %arg4[%c0_5, %c0_6] : memref<96x256xbf16, #tpu.memory_space<vmem>>, vector<96x256xbf16>
    %cst_7 = arith.constant dense<0.000000e+00> : vector<8x256xf32>
    %5 = tpu.matmul %3, %4, %cst_7 {dimension_numbers = #tpu.dot_dimension_numbers<[1], [0], [0], [1], [0, 0, 1, 1], [], []>} : vector<8x96xbf16>, vector<96x256xbf16>, vector<8x256xf32> -> vector<8x256xf32>
    %6 = arith.addf %2, %5 : vector<8x256xf32>
    %c0_8 = arith.constant 0 : index
    %c0_9 = arith.constant 0 : index
    %7 = vector.load %arg10[%c0_8, %c0_9] : memref<1x896xf32, #tpu.memory_space<vmem>>, vector<1x256xf32>
    %8 = vector.broadcast %7 : vector<1x256xf32> to vector<8x256xf32>
    %9 = arith.addf %6, %8 : vector<8x256xf32>
    %cst_10 = arith.constant 0.000000e+00 : f32
    %10 = vector.broadcast %cst_10 : f32 to vector<8x256xf32>
    %11 = arith.maximumf %9, %10 : vector<8x256xf32>
    %12 = arith.truncf %11 : vector<8x256xf32> to vector<8x256xbf16>
    %c0_11 = arith.constant 0 : index
    %c0_12 = arith.constant 0 : index
    %13 = vector.load %arg5[%c0_11, %c0_12] : memref<256x128xbf16, #tpu.memory_space<vmem>>, vector<256x128xbf16>
    %cst_13 = arith.constant dense<0.000000e+00> : vector<8x128xf32>
    %14 = tpu.matmul %12, %13, %cst_13 {dimension_numbers = #tpu.dot_dimension_numbers<[1], [0], [0], [1], [0, 0, 1, 1], [], []>} : vector<8x256xbf16>, vector<256x128xbf16>, vector<8x128xf32> -> vector<8x128xf32>
    %c0_14 = arith.constant 0 : index
    %c256 = arith.constant 256 : index
    %15 = vector.load %arg10[%c0_14, %c256] : memref<1x896xf32, #tpu.memory_space<vmem>>, vector<1x128xf32>
    %16 = vector.broadcast %15 : vector<1x128xf32> to vector<8x128xf32>
    %17 = arith.addf %14, %16 : vector<8x128xf32>
    %cst_15 = arith.constant 0.000000e+00 : f32
    %18 = vector.broadcast %cst_15 : f32 to vector<8x128xf32>
    %19 = arith.maximumf %17, %18 : vector<8x128xf32>
    %20 = arith.truncf %19 : vector<8x128xf32> to vector<8x128xbf16>
    %c0_16 = arith.constant 0 : index
    %c0_17 = arith.constant 0 : index
    %21 = vector.load %arg6[%c0_16, %c0_17] : memref<128x128xbf16, #tpu.memory_space<vmem>>, vector<128x128xbf16>
    %cst_18 = arith.constant dense<0.000000e+00> : vector<8x128xf32>
    %22 = tpu.matmul %20, %21, %cst_18 {dimension_numbers = #tpu.dot_dimension_numbers<[1], [0], [0], [1], [0, 0, 1, 1], [], []>} : vector<8x128xbf16>, vector<128x128xbf16>, vector<8x128xf32> -> vector<8x128xf32>
    %c0_19 = arith.constant 0 : index
    %c384 = arith.constant 384 : index
    %23 = vector.load %arg10[%c0_19, %c384] : memref<1x896xf32, #tpu.memory_space<vmem>>, vector<1x128xf32>
    %24 = vector.broadcast %23 : vector<1x128xf32> to vector<8x128xf32>
    %25 = arith.addf %22, %24 : vector<8x128xf32>
    %cst_20 = arith.constant 0.000000e+00 : f32
    %26 = vector.broadcast %cst_20 : f32 to vector<8x128xf32>
    %27 = arith.maximumf %25, %26 : vector<8x128xf32>
    %28 = arith.truncf %27 : vector<8x128xf32> to vector<8x128xbf16>
    %c0_21 = arith.constant 0 : index
    %c0_22 = arith.constant 0 : index
    %29 = vector.load %arg7[%c0_21, %c0_22] : memref<128x128xbf16, #tpu.memory_space<vmem>>, vector<128x128xbf16>
    %cst_23 = arith.constant dense<0.000000e+00> : vector<8x128xf32>
    %30 = tpu.matmul %28, %29, %cst_23 {dimension_numbers = #tpu.dot_dimension_numbers<[1], [0], [0], [1], [0, 0, 1, 1], [], []>} : vector<8x128xbf16>, vector<128x128xbf16>, vector<8x128xf32> -> vector<8x128xf32>
    %c0_24 = arith.constant 0 : index
    %c512 = arith.constant 512 : index
    %31 = vector.load %arg10[%c0_24, %c512] : memref<1x896xf32, #tpu.memory_space<vmem>>, vector<1x128xf32>
    %32 = vector.broadcast %31 : vector<1x128xf32> to vector<8x128xf32>
    %33 = arith.addf %30, %32 : vector<8x128xf32>
    %cst_25 = arith.constant 0.000000e+00 : f32
    %34 = vector.broadcast %cst_25 : f32 to vector<8x128xf32>
    %35 = arith.maximumf %33, %34 : vector<8x128xf32>
    %36 = arith.truncf %35 : vector<8x128xf32> to vector<8x128xbf16>
    %c0_26 = arith.constant 0 : index
    %c0_27 = arith.constant 0 : index
    %37 = vector.load %arg8[%c0_26, %c0_27] : memref<128x128xbf16, #tpu.memory_space<vmem>>, vector<128x128xbf16>
    %cst_28 = arith.constant dense<0.000000e+00> : vector<8x128xf32>
    %38 = tpu.matmul %36, %37, %cst_28 {dimension_numbers = #tpu.dot_dimension_numbers<[1], [0], [0], [1], [0, 0, 1, 1], [], []>} : vector<8x128xbf16>, vector<128x128xbf16>, vector<8x128xf32> -> vector<8x128xf32>
    %c0_29 = arith.constant 0 : index
    %c640 = arith.constant 640 : index
    %39 = vector.load %arg10[%c0_29, %c640] : memref<1x896xf32, #tpu.memory_space<vmem>>, vector<1x128xf32>
    %40 = vector.broadcast %39 : vector<1x128xf32> to vector<8x128xf32>
    %41 = arith.addf %38, %40 : vector<8x128xf32>
    %cst_30 = arith.constant 0.000000e+00 : f32
    %42 = vector.broadcast %cst_30 : f32 to vector<8x128xf32>
    %43 = arith.maximumf %41, %42 : vector<8x128xf32>
    %44 = arith.truncf %43 : vector<8x128xf32> to vector<8x128xbf16>
    %c0_31 = arith.constant 0 : index
    %c0_32 = arith.constant 0 : index
    %45 = vector.load %arg9[%c0_31, %c0_32] : memref<128x128xbf16, #tpu.memory_space<vmem>>, vector<128x128xbf16>
    %cst_33 = arith.constant dense<0.000000e+00> : vector<8x128xf32>
    %46 = tpu.matmul %44, %45, %cst_33 {dimension_numbers = #tpu.dot_dimension_numbers<[1], [0], [0], [1], [0, 0, 1, 1], [], []>} : vector<8x128xbf16>, vector<128x128xbf16>, vector<8x128xf32> -> vector<8x128xf32>
    %c0_34 = arith.constant 0 : index
    %c768 = arith.constant 768 : index
    %47 = vector.load %arg10[%c0_34, %c768] : memref<1x896xf32, #tpu.memory_space<vmem>>, vector<1x128xf32>
    %48 = vector.broadcast %47 : vector<1x128xf32> to vector<8x128xf32>
    %49 = arith.addf %46, %48 : vector<8x128xf32>
    %c0_35 = arith.constant 0 : index
    %c0_36 = arith.constant 0 : index
    %50 = vector.load %arg11[%c0_35, %c0_36] : memref<8x128xf32, #tpu.memory_space<vmem>>, vector<8x128xf32>
    tpu.vector_store %arg11[%c0_35, %c0_36], %49 {strides = array<i32>} : memref<8x128xf32, #tpu.memory_space<vmem>>, vector<8x128xf32>,
    return
  }
  func.func @transform_0(%arg0: i32) -> (i32, i32) {
    %c0_i32 = arith.constant 0 : i32
    %c0_i32_0 = arith.constant 0 : i32
    return %arg0, %c0_i32 : i32, i32
  }
  func.func @transform_1(%arg0: i32) -> (i32, i32) {
    %c0_i32 = arith.constant 0 : i32
    %c0_i32_0 = arith.constant 0 : i32
    return %arg0, %c0_i32 : i32, i32
  }
  func.func @transform_2(%arg0: i32) -> (i32, i32) {
    %c0_i32 = arith.constant 0 : i32
    %c0_i32_0 = arith.constant 0 : i32
    %c0_i32_1 = arith.constant 0 : i32
    return %c0_i32, %c0_i32_0 : i32, i32
  }
  func.func @transform_3(%arg0: i32) -> (i32, i32) {
    %c0_i32 = arith.constant 0 : i32
    %c0_i32_0 = arith.constant 0 : i32
    %c0_i32_1 = arith.constant 0 : i32
    return %c0_i32, %c0_i32_0 : i32, i32
  }
  func.func @transform_4(%arg0: i32) -> (i32, i32) {
    %c0_i32 = arith.constant 0 : i32
    %c0_i32_0 = arith.constant 0 : i32
    %c0_i32_1 = arith.constant 0 : i32
    return %c0_i32, %c0_i32_0 : i32, i32
  }
  func.func @transform_5(%arg0: i32) -> (i32, i32) {
    %c0_i32 = arith.constant 0 : i32
    %c0_i32_0 = arith.constant 0 : i32
    %c0_i32_1 = arith.constant 0 : i32
    return %c0_i32, %c0_i32_0 : i32, i32
  }
  func.func @transform_6(%arg0: i32) -> (i32, i32) {
    %c0_i32 = arith.constant 0 : i32
    %c0_i32_0 = arith.constant 0 : i32
    %c0_i32_1 = arith.constant 0 : i32
    return %c0_i32, %c0_i32_0 : i32, i32
  }
  func.func @transform_7(%arg0: i32) -> (i32, i32) {
    %c0_i32 = arith.constant 0 : i32
    %c0_i32_0 = arith.constant 0 : i32
    %c0_i32_1 = arith.constant 0 : i32
    return %c0_i32, %c0_i32_0 : i32, i32
  }
  func.func @transform_8(%arg0: i32) -> (i32, i32) {
    %c0_i32 = arith.constant 0 : i32
    %c0_i32_0 = arith.constant 0 : i32
    %c0_i32_1 = arith.constant 0 : i32
    return %c0_i32, %c0_i32_0 : i32, i32
  }
  func.func @transform_9(%arg0: i32) -> (i32, i32) {
    %c0_i32 = arith.constant 0 : i32
    %c0_i32_0 = arith.constant 0 : i32
    %c0_i32_1 = arith.constant 0 : i32
    return %c0_i32, %c0_i32_0 : i32, i32
  }
  func.func @transform_10(%arg0: i32) -> (i32, i32) {
    %c0_i32 = arith.constant 0 : i32
    %c0_i32_0 = arith.constant 0 : i32
    return %arg0, %c0_i32 : i32, i32
  }
}

</mosaic_0001>

<bundles_post_ra>
// kernel: tpu_custom_call.1
= control target key start
LH: loop header
LB: loop body
LE: loop exit
PB: predicated region body
PF: predicated region fallthrough
CT: control target
= control target key end

     0   :  { %15 = vsyncpa [#allocation3], 0  ;;  %s1831_s0 = inlined_call_operand.hbm [shape: bf16[8,32], index: 0, kind: input, shape index: {}]   ;;  %s1832_s1 = inlined_call_operand.hbm [shape: bf16[8,96], index: 1, kind: input, shape index: {}]   ;;  %s1833_s2 = inlined_call_operand.hbm [shape: bf16[32,256], index: 2, kind: input, shape index: {}]   ;;  %s1834_s3 = inlined_call_operand.hbm [shape: bf16[96,256], index: 3, kind: input, shape index: {}]   ;;  %s1835_s4 = inlined_call_operand.hbm [shape: bf16[256,128], index: 4, kind: input, shape index: {}]   ;;  %s1836_s5 = inlined_call_operand.hbm [shape: bf16[128,128], index: 5, kind: input, shape index: {}]   ;;  %s1837_s6 = inlined_call_operand.hbm [shape: bf16[128,128], index: 6, kind: input, shape index: {}]   ;;  %s1838_s7 = inlined_call_operand.hbm [shape: bf16[128,128], index: 7, kind: input, shape index: {}]   ;;  %s1839_s8 = inlined_call_operand.hbm [shape: bf16[128,128], index: 8, kind: input, shape index: {}]   ;;  %s1840_s9 = inlined_call_operand.vmem [shape: f32[1,896], index: 9, kind: input, shape index: {}]   ;;  %s1841_s10 = inlined_call_operand.hbm [shape: f32[8,128], index: 10, kind: output, shape index: {}]  }
   0x1   :  { %16 = vsyncpa [#allocation6], 0 }
   0x2   :  { %17 = vsyncpa [#allocation9], 0 }
   0x3   :  { %18 = vsyncpa [#allocation12], 0 }
   0x4   :  { %19 = vsyncpa [#allocation15], 0 }
   0x5   :  { %20 = vsyncpa [#allocation4], 0  ;;  %s1538_s13 = smov [#allocation5]   ;;  %s1306_s17 = scalar_lea.hbm %s1832_s1, 64 }
   0x6   :  { %s37_s14 = sshll.u32 %s1538_s13, 4  ;;  %p1307_p0 = scmp.ne.s32.totalorder %s1832_s1, %s1306_s17  ;;  %s38_s14 = int_to_ptr.vmem [resolvable:$true] %s37_s14 }
   0x7   :  { %p1310_p1 = scmp.lt.u32.totalorder %s1306_s17, %s1832_s1 }
   0x9   :  { %p1312_p2 = pnand %p1310_p1, %p1307_p0 }
   0xb   :  { %1315 = shalt.err (!%p1312_p2)
}
   0xc   :  { %s1316_s22 = scalar_lea.vmem %s38_s14, 64  ;;  %p1321_p4 = scmp.lt.s32.totalorder %s38_s14, %s38_s14 }
   0xd   :  { %p1317_p3 = scmp.ne.s32.totalorder %s38_s14, %s1316_s22  ;;  %p1322_p5 = scmp.lt.s32.totalorder %s1316_s22, %s1316_s22 }
   0xf   :  { %p1323_p6 = por %p1322_p5, %p1321_p4 }
  0x11   :  { %p1324_p7 = pnand %p1323_p6, %p1317_p3 }
  0x13   :  { %1327 = shalt.err (!%p1324_p7)
}
  0x14   :  { %40 = dma.hbm_to_vmem [thread:$0]  %s1832_s1, 64, %s38_s14, [#allocation6]  }
  0x15   :  { %s1539_s25 = smov [#allocation8]   ;;  %s1328_s29 = scalar_lea.hbm %s1834_s3, 1536 }
  0x16   :  { %s58_s26 = sshll.u32 %s1539_s25, 4  ;;  %p1329_p8 = scmp.ne.s32.totalorder %s1834_s3, %s1328_s29  ;;  %s59_s26 = int_to_ptr.vmem [resolvable:$true] %s58_s26 }
  0x17   :  { %p1332_p9 = scmp.lt.u32.totalorder %s1328_s29, %s1834_s3 }
  0x19   :  { %p1334_p10 = pnand %p1332_p9, %p1329_p8 }
  0x1b   :  { %1337 = shalt.err (!%p1334_p10)
}
  0x1c   :  { %s1338_s15 = scalar_lea.vmem %s59_s26, 1536  ;;  %p1343_p12 = scmp.lt.s32.totalorder %s59_s26, %s59_s26 }
  0x1d   :  { %p1339_p11 = scmp.ne.s32.totalorder %s59_s26, %s1338_s15  ;;  %p1344_p13 = scmp.lt.s32.totalorder %s1338_s15, %s1338_s15 }
  0x1f   :  { %p1345_p0 = por %p1344_p13, %p1343_p12 }
  0x21   :  { %p1346_p1 = pnand %p1345_p0, %p1339_p11 }
  0x23   :  { %1349 = shalt.err (!%p1346_p1)
}
  0x24   :  { %s1540_s1 = smov 128   ;;  %s1541_s14 = smov 8  }
  0x25   :  { %64 = dma.hbm_to_vmem [thread:$0]  %s1834_s3, 1536, %s59_s26, [#allocation9], %s1540_s1, %s1540_s1, %s1541_s14  }
  0x26   :  { %s1542_s18 = smov [#allocation11]   ;;  %s1543_s20 = smov [#allocation14]  }
  0x27   :  { %s82_s19 = sshll.u32 %s1542_s18, 4  ;;  %s106_s21 = sshll.u32 %s1543_s20, 4  ;;  %s83_s19 = int_to_ptr.vmem [resolvable:$true] %s82_s19  ;;  %s1637_s21 = int_to_ptr.vmem [resolvable:$true] %s106_s21 }
  0x28   :  { %s1350_s24 = scalar_lea.hbm %s1836_s5, 1024 }
  0x29   :  { %p1351_p2 = scmp.ne.s32.totalorder %s1836_s5, %s1350_s24  ;;  %p1354_p3 = scmp.lt.u32.totalorder %s1350_s24, %s1836_s5 }
  0x2b   :  { %p1356_p4 = pnand %p1354_p3, %p1351_p2 }
  0x2d   :  { %1359 = shalt.err (!%p1356_p4)
}
  0x2e   :  { %s1360_s3 = scalar_lea.vmem %s83_s19, 1024  ;;  %p1365_p6 = scmp.lt.s32.totalorder %s83_s19, %s83_s19 }
  0x2f   :  { %p1361_p5 = scmp.ne.s32.totalorder %s83_s19, %s1360_s3  ;;  %p1366_p7 = scmp.lt.s32.totalorder %s1360_s3, %s1360_s3 }
  0x31   :  { %p1367_p8 = por %p1366_p7, %p1365_p6 }
  0x33   :  { %p1368_p9 = pnand %p1367_p8, %p1361_p5 }
  0x35   :  { %1371 = shalt.err (!%p1368_p9)
}
  0x36   :  { %s1544_s26 = smov 64   ;;  %s1545_s30 = smov 4  }
  0x37   :  { %88 = dma.hbm_to_vmem [thread:$0]  %s1836_s5, 1024, %s83_s19, [#allocation12], %s1544_s26, %s1544_s26, %s1545_s30  }
  0x38   :  { %s1372_s16 = scalar_lea.hbm %s1838_s7, 1024 }
  0x39   :  { %p1373_p10 = scmp.ne.s32.totalorder %s1838_s7, %s1372_s16  ;;  %p1376_p11 = scmp.lt.u32.totalorder %s1372_s16, %s1838_s7 }
  0x3b   :  { %p1378_p12 = pnand %p1376_p11, %p1373_p10 }
  0x3d   :  { %1381 = shalt.err (!%p1378_p12)
}
  0x3e   :  { %s1382_s23 = scalar_lea.vmem %s1637_s21, 1024  ;;  %p1387_p0 = scmp.lt.s32.totalorder %s1637_s21, %s1637_s21 }
  0x3f   :  { %p1383_p13 = scmp.ne.s32.totalorder %s1637_s21, %s1382_s23  ;;  %p1388_p1 = scmp.lt.s32.totalorder %s1382_s23, %s1382_s23 }
  0x41   :  { %p1389_p2 = por %p1388_p1, %p1387_p0 }
  0x43   :  { %p1390_p3 = pnand %p1389_p2, %p1383_p13 }
  0x45   :  { %1393 = shalt.err (!%p1390_p3)
}
  0x46   :  { %112 = dma.hbm_to_vmem [thread:$0]  %s1838_s7, 1024, %s1637_s21, [#allocation15], %s1544_s26, %s1544_s26, %s1545_s30  }
  0x47   :  { %s1546_s24 = smov [#allocation2]   ;;  %s1547_s27 = smov [#allocation7]  }
  0x48   :  { %s27_s25 = sshll.u32 %s1546_s24, 4  ;;  %s46_s28 = sshll.u32 %s1547_s27, 4  ;;  %s28_s25 = int_to_ptr.vmem [resolvable:$true] %s27_s25  ;;  %s1674_s28 = int_to_ptr.vmem [resolvable:$true] %s46_s28 }
  0x49   :  { %s1394_s11 = scalar_lea.hbm %s1831_s0, 64 }
  0x4a   :  { %p1395_p4 = scmp.ne.s32.totalorder %s1831_s0, %s1394_s11  ;;  %p1398_p5 = scmp.lt.u32.totalorder %s1394_s11, %s1831_s0 }
  0x4c   :  { %p1400_p6 = pnand %p1398_p5, %p1395_p4 }
  0x4e   :  { %1403 = shalt.err (!%p1400_p6)
}
  0x4f   :  { %s1404_s7 = scalar_lea.vmem %s28_s25, 64  ;;  %p1409_p8 = scmp.lt.s32.totalorder %s28_s25, %s28_s25 }
  0x50   :  { %p1405_p7 = scmp.ne.s32.totalorder %s28_s25, %s1404_s7  ;;  %p1410_p9 = scmp.lt.s32.totalorder %s1404_s7, %s1404_s7 }
  0x52   :  { %p1411_p10 = por %p1410_p9, %p1409_p8 }
  0x54   :  { %p1412_p11 = pnand %p1411_p10, %p1405_p7 }
  0x56   :  { %1415 = shalt.err (!%p1412_p11)
}
  0x57   :  { %30 = dma.hbm_to_vmem [thread:$0]  %s1831_s0, 64, %s28_s25, [#allocation3]  }
  0x58   :  { %s1416_s22 = scalar_lea.hbm %s1833_s2, 512 }
  0x59   :  { %p1417_p12 = scmp.ne.s32.totalorder %s1833_s2, %s1416_s22  ;;  %p1420_p13 = scmp.lt.u32.totalorder %s1416_s22, %s1833_s2 }
  0x5b   :  { %p1422_p0 = pnand %p1420_p13, %p1417_p12 }
  0x5d   :  { %1425 = shalt.err (!%p1422_p0)
}
  0x5e   :  { %s1426_s27 = scalar_lea.vmem %s1674_s28, 512  ;;  %p1431_p2 = scmp.lt.s32.totalorder %s1674_s28, %s1674_s28 }
  0x5f   :  { %p1427_p1 = scmp.ne.s32.totalorder %s1674_s28, %s1426_s27  ;;  %p1432_p3 = scmp.lt.s32.totalorder %s1426_s27, %s1426_s27 }
  0x61   :  { %p1433_p4 = por %p1432_p3, %p1431_p2 }
  0x63   :  { %p1434_p5 = pnand %p1433_p4, %p1427_p1 }
  0x65   :  { %1437 = shalt.err (!%p1434_p5)
}
  0x66   :  { %52 = dma.hbm_to_vmem [thread:$0]  %s1833_s2, 512, %s1674_s28, [#allocation6], %s1540_s1, %s1540_s1, %s1541_s14  }
  0x67   :  { %s1548_s29 = smov [#allocation10]   ;;  %s1549_s11 = smov [#allocation13]  }
  0x68   :  { %s70_s3 = sshll.u32 %s1548_s29, 4  ;;  %s94_s12 = sshll.u32 %s1549_s11, 4  ;;  %s71_s3 = int_to_ptr.vmem [resolvable:$true] %s70_s3  ;;  %s1708_s12 = int_to_ptr.vmem [resolvable:$true] %s94_s12 }
  0x69   :  { %s1438_s16 = scalar_lea.hbm %s1835_s4, 2048 }
  0x6a   :  { %p1439_p6 = scmp.ne.s32.totalorder %s1835_s4, %s1438_s16  ;;  %p1442_p7 = scmp.lt.u32.totalorder %s1438_s16, %s1835_s4 }
  0x6c   :  { %p1444_p8 = pnand %p1442_p7, %p1439_p6 }
  0x6e   :  { %1447 = shalt.err (!%p1444_p8)
}
  0x6f   :  { %s1448_s2 = scalar_lea.vmem %s71_s3, 2048  ;;  %p1453_p10 = scmp.lt.s32.totalorder %s71_s3, %s71_s3 }
  0x70   :  { %p1449_p9 = scmp.ne.s32.totalorder %s71_s3, %s1448_s2  ;;  %p1454_p11 = scmp.lt.s32.totalorder %s1448_s2, %s1448_s2 }
  0x72   :  { %p1455_p12 = por %p1454_p11, %p1453_p10 }
  0x74   :  { %p1456_p13 = pnand %p1455_p12, %p1449_p9 }
  0x76   :  { %1459 = shalt.err (!%p1456_p13)
}
  0x77   :  { %76 = dma.hbm_to_vmem [thread:$0]  %s1835_s4, 2048, %s71_s3, [#allocation9], %s1544_s26, %s1544_s26, %s1545_s30  }
  0x78   :  { %s1460_s22 = scalar_lea.hbm %s1837_s6, 1024 }
  0x79   :  { %p1461_p0 = scmp.ne.s32.totalorder %s1837_s6, %s1460_s22  ;;  %p1464_p1 = scmp.lt.u32.totalorder %s1460_s22, %s1837_s6 }
  0x7b   :  { %p1466_p2 = pnand %p1464_p1, %p1461_p0 }
  0x7d   :  { %1469 = shalt.err (!%p1466_p2)
}
  0x7e   :  { %s1470_s27 = scalar_lea.vmem %s1708_s12, 1024  ;;  %p1475_p4 = scmp.lt.s32.totalorder %s1708_s12, %s1708_s12 }
  0x7f   :  { %p1471_p3 = scmp.ne.s32.totalorder %s1708_s12, %s1470_s27  ;;  %p1476_p5 = scmp.lt.s32.totalorder %s1470_s27, %s1470_s27 }
  0x81   :  { %p1477_p6 = por %p1476_p5, %p1475_p4 }
  0x83   :  { %p1478_p7 = pnand %p1477_p6, %p1471_p3 }
  0x85   :  { %1481 = shalt.err (!%p1478_p7)
}
  0x86   :  { %100 = dma.hbm_to_vmem [thread:$0]  %s1837_s6, 1024, %s1708_s12, [#allocation12], %s1544_s26, %s1544_s26, %s1545_s30  }
  0x87   :  { %s1550_s25 = smov [#allocation16]   ;;  %s1482_s13 = scalar_lea.hbm %s1839_s8, 1024 }
  0x88   :  { %s118_s29 = sshll.u32 %s1550_s25, 4  ;;  %p1483_p8 = scmp.ne.s32.totalorder %s1839_s8, %s1482_s13  ;;  %s119_s29 = int_to_ptr.vmem [resolvable:$true] %s118_s29 }
  0x89   :  { %p1486_p9 = scmp.lt.u32.totalorder %s1482_s13, %s1839_s8 }
  0x8b   :  { %p1488_p10 = pnand %p1486_p9, %p1483_p8 }
  0x8d   :  { %1491 = shalt.err (!%p1488_p10)
}
  0x8e   :  { %s1492_s17 = scalar_lea.vmem %s119_s29, 1024  ;;  %p1497_p12 = scmp.lt.s32.totalorder %s119_s29, %s119_s29 }
  0x8f   :  { %p1493_p11 = scmp.ne.s32.totalorder %s119_s29, %s1492_s17  ;;  %p1498_p13 = scmp.lt.s32.totalorder %s1492_s17, %s1492_s17 }
  0x91   :  { %p1499_p0 = por %p1498_p13, %p1497_p12 }
  0x93   :  { %p1500_p1 = pnand %p1499_p0, %p1493_p11 }
  0x95   :  { %1503 = shalt.err (!%p1500_p1)
}
  0x96   :  { %124 = dma.hbm_to_vmem [thread:$0]  %s1839_s8, 1024, %s119_s29, [#allocation15], %s1544_s26, %s1544_s26, %s1545_s30  }
  0x97   :  { %1526 = dma.done.wait [#allocation3], 64  }
  0x98   :  { %1527 = vsyncadd [#allocation3], 4294967232 }
  0x99   :  { %1528 = dma.done.wait [#allocation6], 576  }
  0x9a   :  { %1529 = vsyncadd [#allocation6], 4294966720 }
  0x9b   :  { %1530 = dma.done.wait [#allocation9], 3584  }
  0x9c   :  { %1531 = vsyncadd [#allocation9], 4294963712 }
  0x9d   :  { %1532 = dma.done.wait [#allocation12], 2048  }
  0x9e   :  { %1533 = vsyncadd [#allocation12], 4294965248 }
  0x9f   :  { %1534 = dma.done.wait [#allocation15], 2048  }
  0xa0   :  { %1535 = vsyncadd [#allocation15], 4294965248  ;;  %v1551_v0 = vmov 0   ;;  %v1234_v1 = vld [vmem:[#allocation8 + $0x4] ss:$8 sps:$4 sm:$0xff]   ;;  %v1262_v16 = vld [vmem:[#allocation10 + $0x50] sm:$0xff]   ;;  %v345_v42 = vlaneseq }
  0xa1   :  { %269 = vmatprep.mubr.bf16.mxu0 %v1551_v0  ;;  %v1236_v2 = vld [vmem:[#allocation8] ss:$8 sps:$4 sm:$0xff]   ;;  %237 = vmatprep.subr.bf16.mxu0 %v1234_v1  ;;  %v1237_v3 = vld [vmem:[#allocation8 + $0x14] ss:$8 sps:$4 sm:$0xff]   ;;  %v1239_v4 = vld [vmem:[#allocation8 + $0x10] ss:$8 sps:$4 sm:$0xff]  }
  0xa2   :  { %238 = vmatpush1.bf16.msra.mxu0 %v1236_v2  ;;  %v1240_v5 = vld [vmem:[#allocation8 + $0x24] ss:$8 sps:$4 sm:$0xff]   ;;  %v1242_v6 = vld [vmem:[#allocation8 + $0x20] ss:$8 sps:$4 sm:$0xff]   ;;  %v1243_v7 = vld [vmem:[#allocation8 + $0x34] ss:$8 sps:$4 sm:$0xff]  }
  0xa3   :  { %239 = vmatprep.subr.bf16.mxu0 %v1237_v3  ;;  %v1245_v8 = vld [vmem:[#allocation8 + $0x30] ss:$8 sps:$4 sm:$0xff]   ;;  %v1246_v9 = vld [vmem:[#allocation8 + $0x44] ss:$8 sps:$4 sm:$0xff]   ;;  %v1248_v11 = vld [vmem:[#allocation8 + $0x40] ss:$8 sps:$4 sm:$0xff]  }
  0xa4   :  { %v1258_v10 = vld [vmem:[#allocation10 + $0x40] sm:$0xff]   ;;  %v1249_v13 = vld [vmem:[#allocation8 + $0x54] ss:$8 sps:$4 sm:$0xff]   ;;  %v1260_v14 = vld [vmem:[#allocation10 + $0x48] sm:$0xff]   ;;  %vm233_vm0 = vcmask 785408   ;;  %vm298_vm1 = vcmask 261120  }
  0xa5   :  { %v1259_v12 = vld [vmem:[#allocation10] sm:$0xff]   ;;  %1079 = vmatprep.subr.bf16.mxu1 %v1258_v10  ;;  %v1261_v15 = vld [vmem:[#allocation10 + $0x8] sm:$0xff]   ;;  %v1251_v17 = vld [vmem:[#allocation8 + $0x50] ss:$8 sps:$4 sm:$0xff]   ;;  %v1552_v36 = vmov 0.0   ;;  %v346_v43 = vshrl.u32 %v345_v42, 7 }
  0xa6   :  { %240 = vmatpush1.bf16.msra.mxu0 %v1239_v4  ;;  %1080 = vmatpush3.bf16.msra.mxu1 %v1259_v12  ;;  %v1263_v18 = vld [vmem:[#allocation10 + $0x10] sm:$0xff]   ;;  %v1254_v19 = vld [vmem:[#allocation7 + $0x4] ss:$8 sps:$4 sm:$0xff]   ;;  %v1264_v20 = vld [vmem:[#allocation10 + $0x58] sm:$0xff]   ;;  %vm1553_vm2 = vmmov 0   ;;  %s1554_s19 = smov [#allocation17]  }
  0xa7   :  { %241 = vmatprep.subr.bf16.mxu0 %v1240_v5  ;;  %1081 = vmatprep.subr.bf16.mxu1 %v1260_v14  ;;  %v160_v21 = vld [vmem:[#allocation5] sm:$0xf]  ;;  %v1252_v22 = vld [vmem:[#allocation7] ss:$8 sps:$4 sm:$0xff]   ;;  %v1255_v24 = vld [vmem:[#allocation7 + $0x10] ss:$8 sps:$4 sm:$0xff]  }
  0xa8   :  { %v1257_v23 = vld [vmem:[#allocation7 + $0x14] ss:$8 sps:$4 sm:$0xff]   ;;  %v155_v25 = vld [vmem:[#allocation2] sm:$0xf]  ;;  %v1266_v27 = vld [vmem:[#allocation10 + $0x60] sm:$0xff]   ;;  %v347_v48 = vsub.s32 0, %v346_v43 }
  0xa9   :  { %v1265_v26 = vld [vmem:[#allocation10 + $0x18] sm:$0xff]   ;;  %v1267_v28 = vld [vmem:[#allocation10 + $0x20] sm:$0xff]   ;;  %v1268_v29 = vld [vmem:[#allocation10 + $0x68] sm:$0xff]   ;;  %v351_v50 = vsub.s32 1, %v346_v43  ;;  %s995_s24 = sshll.u32 %s1554_s19, 4  ;;  %s996_s24 = int_to_ptr.vmem [resolvable:$true] %s995_s24 }
  0xaa   :  { %242 = vmatpush1.bf16.msra.mxu0 %v1242_v6  ;;  %1082 = vmatpush3.bf16.msra.mxu1 %v1261_v15  ;;  %v1269_v30 = vld [vmem:[#allocation10 + $0x28] sm:$0xff]   ;;  %v1270_v31 = vld [vmem:[#allocation10 + $0x70] sm:$0xff]   ;;  %v1272_v33 = vld [vmem:[#allocation10 + $0x78] sm:$0xff]   ;;  %s1504_s27 = scalar_lea.vmem %s996_s24, 128  ;;  %p1509_p3 = scmp.lt.s32.totalorder %s996_s24, %s996_s24 }
  0xab   :  { %243 = vmatprep.subr.bf16.mxu0 %v1243_v7  ;;  %1083 = vmatprep.subr.bf16.mxu1 %v1262_v16  ;;  %v1271_v32 = vld [vmem:[#allocation10 + $0x30] sm:$0xff]   ;;  %v1273_v34 = vld [vmem:[#allocation10 + $0x38] sm:$0xff]   ;;  %v1274_v35 = vld [vmem:[#allocation11] sm:$0xff]   ;;  %p1505_p2 = scmp.ne.s32.totalorder %s996_s24, %s1504_s27  ;;  %p1510_p4 = scmp.lt.s32.totalorder %s1504_s27, %s1504_s27 }
  0xac   :  { %v1275_v37 = vld [vmem:[#allocation11 + $0x8] sm:$0xff]   ;;  %v1276_v38 = vld [vmem:[#allocation11 + $0x10] sm:$0xff]   ;;  %v1277_v39 = vld [vmem:[#allocation11 + $0x18] sm:$0xff]  }
  0xad   :  { %v1278_v40 = vld [vmem:[#allocation11 + $0x20] sm:$0xff]   ;;  %v1279_v41 = vld [vmem:[#allocation11 + $0x28] sm:$0xff]   ;;  %v343_v49 = vld [vmem:[%s1840_s9] sm:$0x3]  ;;  %p1511_p5 = por %p1510_p4, %p1509_p3 }
  0xae   :  { %244 = vmatpush1.bf16.msra.mxu0 %v1245_v8  ;;  %1084 = vmatpush3.bf16.msra.mxu1 %v1263_v18  ;;  %v348_v51 = vrot.slane %v343_v49, %v347_v48  ;;  %v352_v53 = vrot.slane %v343_v49, %v351_v50  ;;  %v1280_v1 = vld [vmem:[#allocation11 + $0x30] sm:$0xff]   ;;  %v1281_v2 = vld [vmem:[#allocation11 + $0x38] sm:$0xff]   ;;  %v1282_v3 = vld [vmem:[#allocation13] sm:$0xff]  }
  0xaf   :  { %245 = vmatprep.subr.bf16.mxu0 %v1246_v9  ;;  %1085 = vmatprep.subr.bf16.mxu1 %v1264_v20  ;;  %v1283_v4 = vld [vmem:[#allocation13 + $0x8] sm:$0xff]   ;;  %v1284_v5 = vld [vmem:[#allocation13 + $0x10] sm:$0xff]   ;;  %v1285_v6 = vld [vmem:[#allocation13 + $0x18] sm:$0xff]   ;;  %p1512_p6 = pnand %p1511_p5, %p1505_p2 }
  0xb0   :  { %v1286_v7 = vld [vmem:[#allocation13 + $0x20] sm:$0xff]   ;;  %v1287_v8 = vld [vmem:[#allocation13 + $0x28] sm:$0xff]   ;;  %v1026_v10 = vld [vmem:[%s1840_s9 + $0x2] ss:$0 sm:$0xff] }
  0xb1   :  { %v1288_v18 = vld [vmem:[#allocation13 + $0x30] sm:$0xff]   ;;  %v1290_v20 = vld [vmem:[#allocation14] sm:$0xff]   ;;  %v1303_v42 = vld [vmem:[#allocation16 + $0x28] sm:$0xff]  }
  0xb2   :  { %246 = vmatpush1.bf16.msra.mxu0 %v1248_v11  ;;  %1086 = vmatpush3.bf16.msra.mxu1 %v1265_v26  ;;  %v1043_v26 = vld [vmem:[%s1840_s9 + $0x3] ss:$0 sm:$0xff]  ;;  %v1052_v43 = vld [vmem:[%s1840_s9 + $0x4] ss:$0 sm:$0xff] }
  0xb3   :  { %247 = vmatprep.subr.bf16.mxu0 %v1249_v13  ;;  %1087 = vmatprep.subr.bf16.mxu1 %v1266_v27 }
  0xb6   :  { %248 = vmatpush1.bf16.msra.mxu0 %v1251_v17  ;;  %1088 = vmatpush3.bf16.msra.mxu1 %v1267_v28 }
  0xb7   :  { %302 = vmatprep.subr.bf16.mxu0 %v1254_v19  ;;  %1089 = vmatprep.subr.bf16.mxu1 %v1268_v29  ;;  %v1289_v19 = vld [vmem:[#allocation13 + $0x38] sm:$0xff]  }
  0xb9   :  { %1020 = vmatmul.mubr.msk.bf16.vlgmr.msra.gmra.mrb[0].mxu0 %vm233_vm0, %v160_v21  ;;  %v1291_v21 = vld [vmem:[#allocation14 + $0x8] sm:$0xff]  }
  0xba   :  { %303 = vmatpush1.bf16.msra.mxu0 %v1252_v22  ;;  %334 = vmatprep.mubr.bf16.mxu0 %v1551_v0  ;;  %v1292_v22 = vld [vmem:[#allocation14 + $0x10] sm:$0xff]  }
  0xbb   :  { %304 = vmatprep.subr.bf16.mxu0 %v1257_v23  ;;  %1090 = vmatpush3.bf16.msra.mxu1 %v1269_v30  ;;  %v1293_v23 = vld [vmem:[#allocation14 + $0x18] sm:$0xff]  }
  0xbc   :  { %1091 = vmatprep.subr.bf16.mxu1 %v1270_v31 }
  0xbe   :  { %305 = vmatpush1.bf16.msra.mxu0 %v1255_v24  ;;  %v1294_v24 = vld [vmem:[#allocation14 + $0x20] sm:$0xff]  }
  0xbf   :  { %1092 = vmatpush3.bf16.msra.mxu1 %v1271_v32  ;;  %1137 = vmatprep.subr.bf16.mxu0 %v1552_v36 }
  0xc0   :  { %1093 = vmatprep.subr.bf16.mxu1 %v1272_v33 }
  0xc1   :  { %1025 = vmatmul.mubr.msk.bf16.vlgmr.msra.gmra.mrb[4].mxu0 %vm298_vm1, %v155_v25  ;;  %v1295_v25 = vld [vmem:[#allocation14 + $0x28] sm:$0xff]  }
  0xc2   :  { %1138 = vmatpush3.bf16.msra.mxu0 %v1274_v35  ;;  %1153 = vmatprep.mubr.msk.bf16.mxu0 %vm1553_vm2, %v1552_v36  ;;  %v1297_v35 = vld [vmem:[#allocation14 + $0x38] sm:$0xff]  }
  0xc3   :  { %1094 = vmatpush3.bf16.msra.mxu1 %v1273_v34  ;;  %1139 = vmatprep.subr.bf16.mxu0 %v1552_v36  ;;  %v1296_v34 = vld [vmem:[#allocation14 + $0x30] sm:$0xff]  }
  0xc4   :  { %1157 = vmatprep.subr.bf16.mxu1 %v1552_v36 }
  0xc6   :  { %1140 = vmatpush3.bf16.msra.mxu0 %v1275_v37  ;;  %v1298_v37 = vld [vmem:[#allocation16] sm:$0xff]  }
  0xc7   :  { %1141 = vmatprep.subr.bf16.mxu0 %v1552_v36 }
  0xca   :  { %1142 = vmatpush3.bf16.msra.mxu0 %v1276_v38  ;;  %v1299_v38 = vld [vmem:[#allocation16 + $0x8] sm:$0xff]  }
  0xcb   :  { %1143 = vmatprep.subr.bf16.mxu0 %v1552_v36 }
  0xce   :  { %1144 = vmatpush3.bf16.msra.mxu0 %v1277_v39  ;;  %v1300_v39 = vld [vmem:[#allocation16 + $0x10] sm:$0xff]  }
  0xcf   :  { %1145 = vmatprep.subr.bf16.mxu0 %v1552_v36 }
  0xd2   :  { %1146 = vmatpush3.bf16.msra.mxu0 %v1278_v40  ;;  %v1301_v40 = vld [vmem:[#allocation16 + $0x18] sm:$0xff]  }
  0xd3   :  { %1147 = vmatprep.subr.bf16.mxu0 %v1552_v36 }
  0xd6   :  { %1148 = vmatpush3.bf16.msra.mxu0 %v1279_v41  ;;  %v1302_v41 = vld [vmem:[#allocation16 + $0x20] sm:$0xff]  }
  0xd7   :  { %1149 = vmatprep.subr.bf16.mxu0 %v1552_v36 }
  0xda   :  { %1150 = vmatpush3.bf16.msra.mxu0 %v1280_v1 }
  0xdb   :  { %1151 = vmatprep.subr.bf16.mxu0 %v1552_v36 }
  0xde   :  { %1152 = vmatpush3.bf16.msra.mxu0 %v1281_v2 }
  0xdf   :  { %1177 = vmatprep.subr.bf16.mxu0 %v1552_v36 }
 0x18c   :  { %v271_v44 = vpop.f32.mrb[0].mxu0 }
 0x18d   :  { %v273_v45 = vpop.f32.mrb[1].mxu0 }
 0x18e   :  { %v275_v46 = vpop.f32.mrb[2].mxu0 }
 0x18f   :  { %v276_v47 = vpop.f32.mrb[3].mxu0 }
 0x194   :  { %v336_v52 = vpop.f32.mrb[4].mxu0 }
 0x195   :  { %v337_v54 = vadd.f32 %v336_v52, %v271_v44  ;;  %v338_v55 = vpop.f32.mrb[5].mxu0  ;;  %v1305_v52 = vld [vmem:[#allocation16 + $0x38] sm:$0xff]  }
 0x196   :  { %v339_v56 = vadd.f32 %v338_v55, %v273_v45  ;;  %v340_v57 = vpop.f32.mrb[6].mxu0 }
 0x197   :  { %v355_v58 = vadd.f32 %v348_v51, %v337_v54  ;;  %v341_v59 = vpop.f32.mrb[7].mxu0  ;;  %v1304_v51 = vld [vmem:[#allocation16 + $0x30] sm:$0xff]  }
 0x198   :  { %v356_v60 = vadd.f32 %v352_v53, %v339_v56  ;;  %v1061_v53 = vld [vmem:[%s1840_s9 + $0x5] ss:$0 sm:$0xff] }
 0x199   :  { %v357_v61 = vmax.f32 %v355_v58, 0.0 }
 0x19a   :  { %v358_v62 = vmax.f32 %v356_v60, 0.0 }
 0x19b   :  { %v359_v0 = vpack.c.bf16 %v357_v61, %v357_v61  ;;  %v1070_v61 = vld [vmem:[%s1840_s9 + $0x6] ss:$0 sm:$0xff] }
 0x19c   :  { %v360_v63 = vpack.c.bf16 %v358_v62, %v358_v62 }
 0x19e   :  { %528 = vmatprep.mubr.bf16.mxu1 %v360_v63 }
 0x19f   :  { %529 = vmatmul.mubr.bf16.vlgmr.msra.gmra.mrb[0].mxu1 %v359_v0 }
 0x1a0   :  { %1173 = vmatprep.mubr.msk.bf16.mxu1 %vm1553_vm2, %v1552_v36  ;;  %1158 = vmatpush3.bf16.msra.mxu1 %v1282_v3 }
 0x1a1   :  { %1159 = vmatprep.subr.bf16.mxu1 %v1552_v36 }
 0x1a4   :  { %1160 = vmatpush3.bf16.msra.mxu1 %v1283_v4 }
 0x1a5   :  { %1161 = vmatprep.subr.bf16.mxu1 %v1552_v36 }
 0x1a8   :  { %1162 = vmatpush3.bf16.msra.mxu1 %v1284_v5 }
 0x1a9   :  { %1163 = vmatprep.subr.bf16.mxu1 %v1552_v36 }
 0x1ac   :  { %1164 = vmatpush3.bf16.msra.mxu1 %v1285_v6 }
 0x1ad   :  { %1165 = vmatprep.subr.bf16.mxu1 %v1552_v36 }
 0x1b0   :  { %1166 = vmatpush3.bf16.msra.mxu1 %v1286_v7 }
 0x1b1   :  { %1167 = vmatprep.subr.bf16.mxu1 %v1552_v36 }
 0x1b4   :  { %1168 = vmatpush3.bf16.msra.mxu1 %v1287_v8 }
 0x1b5   :  { %1169 = vmatprep.subr.bf16.mxu1 %v1552_v36 }
 0x1b8   :  { %1170 = vmatpush3.bf16.msra.mxu1 %v1288_v18 }
 0x1b9   :  { %1171 = vmatprep.subr.bf16.mxu1 %v1552_v36 }
 0x1bc   :  { %1172 = vmatpush3.bf16.msra.mxu1 %v1289_v19 }
 0x1bd   :  { %1197 = vmatprep.subr.bf16.mxu1 %v1552_v36 }
 0x272   :  { %v1095_v9 = vpop.f32.mrb[0].mxu1 }
 0x273   :  { %v1096_v11 = vpop.f32.mrb[1].mxu1 }
 0x274   :  { %v1097_v12 = vadd.f32 %v1096_v11, %v1095_v9  ;;  %v1098_v13 = vpop.f32.mrb[2].mxu1 }
 0x275   :  { %v1099_v14 = vpop.f32.mrb[3].mxu1 }
 0x276   :  { %v531_v15 = vadd.f32 %v1097_v12, %v1026_v10 }
 0x278   :  { %v536_v16 = vmax.f32 %v531_v15, 0.0 }
 0x27a   :  { %v537_v17 = vpack.c.bf16 %v536_v16, %v536_v16 }
 0x27c   :  { %1154 = vmatmul.mubr.bf16.vlgmr.msra.gmra.mrb[8].mxu0 %v537_v17 }
 0x27d   :  { %1193 = vmatprep.mubr.msk.bf16.mxu0 %vm1553_vm2, %v1552_v36  ;;  %1178 = vmatpush3.bf16.msra.mxu0 %v1290_v20 }
 0x27e   :  { %1179 = vmatprep.subr.bf16.mxu0 %v1552_v36 }
 0x281   :  { %1180 = vmatpush3.bf16.msra.mxu0 %v1291_v21 }
 0x282   :  { %1181 = vmatprep.subr.bf16.mxu0 %v1552_v36 }
 0x285   :  { %1182 = vmatpush3.bf16.msra.mxu0 %v1292_v22 }
 0x286   :  { %1183 = vmatprep.subr.bf16.mxu0 %v1552_v36 }
 0x289   :  { %1184 = vmatpush3.bf16.msra.mxu0 %v1293_v23 }
 0x28a   :  { %1185 = vmatprep.subr.bf16.mxu0 %v1552_v36 }
 0x28d   :  { %1186 = vmatpush3.bf16.msra.mxu0 %v1294_v24 }
 0x28e   :  { %1187 = vmatprep.subr.bf16.mxu0 %v1552_v36 }
 0x291   :  { %1188 = vmatpush3.bf16.msra.mxu0 %v1295_v25 }
 0x292   :  { %1189 = vmatprep.subr.bf16.mxu0 %v1552_v36 }
 0x295   :  { %1190 = vmatpush3.bf16.msra.mxu0 %v1296_v34 }
 0x296   :  { %1191 = vmatprep.subr.bf16.mxu0 %v1552_v36 }
 0x299   :  { %1192 = vmatpush3.bf16.msra.mxu0 %v1297_v35 }
 0x34f   :  { %v643_v27 = vpop.f32.mrb[8].mxu0 }
 0x350   :  { %v644_v28 = vadd.f32 %v1043_v26, %v643_v27  ;;  %v1155_v29 = vpop.f32.mrb[9].mxu0 }
 0x351   :  { %v646_v30 = vpop.f32.mrb[10].mxu0 }
 0x352   :  { %v649_v31 = vmax.f32 %v644_v28, 0.0  ;;  %v1156_v32 = vpop.f32.mrb[11].mxu0 }
 0x354   :  { %v650_v33 = vpack.c.bf16 %v649_v31, %v649_v31 }
 0x356   :  { %1174 = vmatmul.mubr.bf16.vlgmr.msra.gmra.mrb[4].mxu1 %v650_v33 }
 0x357   :  { %1213 = vmatprep.mubr.msk.bf16.mxu1 %vm1553_vm2, %v1552_v36  ;;  %1198 = vmatpush3.bf16.msra.mxu1 %v1298_v37 }
 0x358   :  { %1199 = vmatprep.subr.bf16.mxu1 %v1552_v36 }
 0x35b   :  { %1200 = vmatpush3.bf16.msra.mxu1 %v1299_v38 }
 0x35c   :  { %1201 = vmatprep.subr.bf16.mxu1 %v1552_v36 }
 0x35f   :  { %1202 = vmatpush3.bf16.msra.mxu1 %v1300_v39 }
 0x360   :  { %1203 = vmatprep.subr.bf16.mxu1 %v1552_v36 }
 0x363   :  { %1204 = vmatpush3.bf16.msra.mxu1 %v1301_v40 }
 0x364   :  { %1205 = vmatprep.subr.bf16.mxu1 %v1552_v36 }
 0x367   :  { %1206 = vmatpush3.bf16.msra.mxu1 %v1302_v41 }
 0x368   :  { %1207 = vmatprep.subr.bf16.mxu1 %v1552_v36 }
 0x36b   :  { %1208 = vmatpush3.bf16.msra.mxu1 %v1303_v42 }
 0x36c   :  { %1209 = vmatprep.subr.bf16.mxu1 %v1552_v36 }
 0x36f   :  { %1210 = vmatpush3.bf16.msra.mxu1 %v1304_v51 }
 0x370   :  { %1211 = vmatprep.subr.bf16.mxu1 %v1552_v36 }
 0x373   :  { %1212 = vmatpush3.bf16.msra.mxu1 %v1305_v52 }
 0x429   :  { %v756_v44 = vpop.f32.mrb[4].mxu1 }
 0x42a   :  { %v757_v45 = vadd.f32 %v1052_v43, %v756_v44  ;;  %v1175_v46 = vpop.f32.mrb[5].mxu1 }
 0x42b   :  { %v759_v47 = vpop.f32.mrb[6].mxu1 }
 0x42c   :  { %v762_v48 = vmax.f32 %v757_v45, 0.0  ;;  %v1176_v49 = vpop.f32.mrb[7].mxu1 }
 0x42e   :  { %v763_v50 = vpack.c.bf16 %v762_v48, %v762_v48 }
 0x430   :  { %1194 = vmatmul.mubr.bf16.vlgmr.msra.gmra.mrb[12].mxu0 %v763_v50 }
 0x503   :  { %v869_v54 = vpop.f32.mrb[12].mxu0 }
 0x504   :  { %v870_v55 = vadd.f32 %v1061_v53, %v869_v54  ;;  %v1195_v56 = vpop.f32.mrb[13].mxu0 }
 0x505   :  { %v872_v57 = vpop.f32.mrb[14].mxu0 }
 0x506   :  { %v875_v58 = vmax.f32 %v870_v55, 0.0  ;;  %v1196_v59 = vpop.f32.mrb[15].mxu0 }
 0x508   :  { %v876_v60 = vpack.c.bf16 %v875_v58, %v875_v58 }
 0x50a   :  { %1214 = vmatmul.mubr.bf16.vlgmr.msra.gmra.mrb[8].mxu1 %v876_v60 }
 0x5dd   :  { %v982_v36 = vpop.f32.mrb[8].mxu1 }
 0x5de   :  { %v983_v62 = vadd.f32 %v1070_v61, %v982_v36  ;;  %v1215_v63 = vpop.f32.mrb[9].mxu1 }
 0x5df   :  { %v985_v0 = vpop.f32.mrb[10].mxu1 }
 0x5e0   :  { %988 = vst [vmem:[#allocation17] sm:$0xff] %v983_v62  ;;  %v1216_v1 = vpop.f32.mrb[11].mxu1 }
 0x5e1   :  { %1515 = shalt.err (!%p1512_p6)
}
 0x5e2   :  { %s1516_s9 = scalar_lea.hbm %s1841_s10, 128 }
 0x5e3   :  { %p1517_p7 = scmp.ne.s32.totalorder %s1841_s10, %s1516_s9  ;;  %p1520_p8 = scmp.lt.u32.totalorder %s1516_s9, %s1841_s10 }
 0x5e5   :  { %p1522_p9 = pnand %p1520_p8, %p1517_p7 }
 0x5e7   :  { %1525 = shalt.err (!%p1522_p9)
}
 0x5e8   :  { %998 = dma.vmem_to_hbm [thread:$0]  %s996_s24, 128, %s1841_s10, [#allocation4]  }
 0x5e9   :  { %1536 = dma.done.wait [#allocation4], 128  }
 0x5ea   :  { %1537 = vsyncadd [#allocation4], 4294967168 }
 0x5eb   :  { %1002 = vsyncpa [#allocation3], 1 }
 0x5ec   :  { %1003 = vsyncpa [#allocation6], 1 }
 0x5ed   :  { %1004 = vsyncpa [#allocation9], 1 }
 0x5ee   :  { %1005 = vsyncpa [#allocation12], 1 }
 0x5ef   :  { %1006 = vsyncpa [#allocation15], 1 }
 0x5f0   :  { %1007 = vsyncpa [#allocation4], 1 }

</bundles_post_ra>
